<compile_context>
chip_gen: v6e
topology: v6e:2x2x1
jax: 0.10.0
libtpu: 0.0.40
codegen_flags: <defaults>
</compile_context>

<pallas_src>
import functools
import math

import jax
import jax.numpy as jnp
from jax import lax
from jax.experimental import pallas as pl
from jax.experimental.pallas import tpu as pltpu

_VMEM_LIMIT = 32 * 1024 * 1024  # safe on every generation incl. v7x's 64 MiB physical VMEM


def _round_up(x, m):
    return ((x + m - 1) // m) * m


# ----------------------------- tiled matmul kernel -----------------------------

def _matmul_kernel(x_ref, w_ref, o_ref, acc_ref):
    @pl.when(pl.program_id(2) == 0)
    def _init():
        acc_ref[...] = jnp.zeros_like(acc_ref)

    acc_ref[...] += jnp.dot(x_ref[...], w_ref[...], preferred_element_type=jnp.float32)

    @pl.when(pl.program_id(2) == pl.num_programs(2) - 1)
    def _finalize():
        o_ref[...] = acc_ref[...].astype(o_ref.dtype)


def _choose_tile(dim, target):
    # If the dim is at least the target, use the (8/128-aligned) target and pad the dim;
    # otherwise use the full dim (block == full array dim satisfies the (8,128) rule).
    return target if dim >= target else dim


def pallas_matmul(x, w, *, out_dtype=jnp.bfloat16, tm=512, tn=512, tk=512):
    """x: [M, K], w: [K, N] -> [M, N]. Tiled/pipelined; pads to tile multiples if needed.
    Note: typical Gemma dims are already multiples of the tiles, so weight padding is a no-op."""
    M, K = x.shape
    K2, N = w.shape
    assert K == K2
    tm = _choose_tile(M, tm)
    tn = _choose_tile(N, tn)
    tk = _choose_tile(K, tk)
    Mp, Kp, Np = _round_up(M, tm), _round_up(K, tk), _round_up(N, tn)
    xp = x if (Mp == M and Kp == K) else jnp.pad(x, ((0, Mp - M), (0, Kp - K)))
    wp = w if (Kp == K and Np == N) else jnp.pad(w, ((0, Kp - K), (0, Np - N)))

    out = pl.pallas_call(
        _matmul_kernel,
        out_shape=jax.ShapeDtypeStruct((Mp, Np), out_dtype),
        grid=(Mp // tm, Np // tn, Kp // tk),
        in_specs=[
            pl.BlockSpec((tm, tk), lambda i, j, k: (i, k)),
            pl.BlockSpec((tk, tn), lambda i, j, k: (k, j)),
        ],
        out_specs=pl.BlockSpec((tm, tn), lambda i, j, k: (i, j)),
        scratch_shapes=[pltpu.VMEM((tm, tn), jnp.float32)],
        compiler_params=pltpu.CompilerParams(
            dimension_semantics=("parallel", "parallel", "arbitrary"),
            vmem_limit_bytes=_VMEM_LIMIT,
        ),
    )(xp, wp)
    if Mp != M or Np != N:
        out = out[:M, :N]
    return out


# ----------------------------- flash attention kernel -----------------------------

def _flash_attn_kernel(q_ref, k_ref, v_ref, o_ref, m_sc, l_sc, acc_sc,
                       *, num_heads, num_kv_heads, head_dim, tq, tkv, causal):
    groups = num_heads // num_kv_heads
    qi = pl.program_id(1)
    ki = pl.program_id(2)
    q_start = qi * tq
    kv_start = ki * tkv

    @pl.when(ki == 0)
    def _init():
        m_sc[...] = jnp.full_like(m_sc, -1e30)
        l_sc[...] = jnp.zeros_like(l_sc)
        acc_sc[...] = jnp.zeros_like(acc_sc)

    def _tile_step(masked):
        if masked:
            row = q_start + lax.broadcasted_iota(jnp.int32, (tq, tkv), 0)
            col = kv_start + lax.broadcasted_iota(jnp.int32, (tq, tkv), 1)
            keep = row >= col
        # All query heads share this grid step -> K/V tile is fetched once per KV head.
        for h in range(num_heads):
            kvh = h // groups
            q_h = q_ref[0, :, h * head_dim:(h + 1) * head_dim]        # (tq, hd) bf16
            k_h = k_ref[0, :, kvh * head_dim:(kvh + 1) * head_dim]    # (tkv, hd) bf16
            v_h = v_ref[0, :, kvh * head_dim:(kvh + 1) * head_dim]    # (tkv, hd) bf16
            # Contract the last dims directly -> no materialized k transpose.
            s = lax.dot_general(q_h, k_h, (((1,), (1,)), ((), ())),
                                preferred_element_type=jnp.float32)    # (tq, tkv) f32
            if masked:
                s = jnp.where(keep, s, -1e30)
            m_prev = m_sc[h]                                           # (tq, 1)
            m_new = jnp.maximum(m_prev, jnp.max(s, axis=-1, keepdims=True))
            p = jnp.exp(s - m_new)
            if masked:
                # Keeps fully-masked rows exact even when tq != tkv.
                p = jnp.where(keep, p, 0.0)
            alpha = jnp.exp(m_prev - m_new)
            l_sc[h] = alpha * l_sc[h] + jnp.sum(p, axis=-1, keepdims=True)
            acc_sc[h] = alpha * acc_sc[h] + jnp.dot(
                p.astype(v_h.dtype), v_h, preferred_element_type=jnp.float32)
            m_sc[h] = m_new

    if causal:
        # Tile fully at/below the diagonal -> no mask work at all.
        no_mask_needed = q_start >= kv_start + (tkv - 1)
        # Tile intersects the diagonal -> compute with mask. Fully-above tiles run neither
        # branch (and their K/V DMA is elided via the clamped index_map).
        needs_mask = jnp.logical_and(q_start + (tq - 1) >= kv_start,
                                     jnp.logical_not(no_mask_needed))
        pl.when(no_mask_needed)(lambda: _tile_step(False))
        pl.when(needs_mask)(lambda: _tile_step(True))
    else:
        _tile_step(False)

    @pl.when(ki == pl.num_programs(2) - 1)
    def _finalize():
        for h in range(num_heads):
            inv_l = pl.reciprocal(l_sc[h], approx=False)   # once per q tile, keep exact
            o_ref[0, :, h * head_dim:(h + 1) * head_dim] = (
                acc_sc[h] * inv_l).astype(o_ref.dtype)


def pallas_attention(q, k, v, *, num_heads, num_kv_heads, head_dim,
                     causal=True, block_q=256, block_kv=256):
    """q: [B, T, nH*hd]; k, v: [B, T, nKV*hd] -> [B, T, nH*hd] (same dtype as q).

    Layout is the natural projection-GEMM layout (no head transposes). 1/sqrt(hd) must
    already be folded into q (done via the Wq weights).
    Note: on v5e keep block_q = block_kv = 128; 256 targets the 2x256 MXU of v6e/v7x.
    """
    B, T, QW = q.shape
    assert QW == num_heads * head_dim
    assert k.shape == (B, T, num_kv_heads * head_dim)
    assert v.shape == k.shape

    tq = min(block_q, _round_up(T, 8))
    tkv = min(block_kv, _round_up(T, 8))
    # Pad T to a common multiple of both tiles (padded keys are masked by causality,
    # padded query rows are sliced off below).
    Tp = _round_up(T, (tq * tkv) // math.gcd(tq, tkv))
    if Tp != T:
        pad = ((0, 0), (0, Tp - T), (0, 0))
        q = jnp.pad(q, pad)
        k = jnp.pad(k, pad)
        v = jnp.pad(v, pad)

    KW = num_kv_heads * head_dim

    def _kv_index_map(b, qi, ki):
        if causal:
            # Clamp skipped (fully masked) steps to the last valid KV tile so their DMA
            # aliases the previous block and the pipeline elides the copy.
            last_valid = (qi * tq + (tq - 1)) // tkv
            ki = jnp.minimum(ki, last_valid)
        return (b, ki, 0)

    kernel = functools.partial(
        _flash_attn_kernel, num_heads=num_heads, num_kv_heads=num_kv_heads,
        head_dim=head_dim, tq=tq, tkv=tkv, causal=causal)

    out = pl.pallas_call(
        kernel,
        out_shape=jax.ShapeDtypeStruct((B, Tp, QW), q.dtype),
        grid=(B, Tp // tq, Tp // tkv),
        in_specs=[
            pl.BlockSpec((1, tq, QW), lambda b, qi, ki: (b, qi, 0)),
            pl.BlockSpec((1, tkv, KW), _kv_index_map),
            pl.BlockSpec((1, tkv, KW), _kv_index_map),
        ],
        out_specs=pl.BlockSpec((1, tq, QW), lambda b, qi, ki: (b, qi, 0)),
        scratch_shapes=[
            pltpu.VMEM((num_heads, tq, 1), jnp.float32),         # running max (per head)
            pltpu.VMEM((num_heads, tq, 1), jnp.float32),         # running denom (per head)
            pltpu.VMEM((num_heads, tq, head_dim), jnp.float32),  # output accumulator
        ],
        compiler_params=pltpu.CompilerParams(
            dimension_semantics=("parallel", "parallel", "arbitrary"),
            vmem_limit_bytes=_VMEM_LIMIT,
        ),
    )(q, k, v)
    if Tp != T:
        out = out[:, :T, :]
    return out


# ----------------------------- RoPE (plain JAX glue) -----------------------------

def rope_cos_sin(position_ids, head_dim, theta):
    inv_freq = 1.0 / (theta ** (jnp.arange(0, head_dim, 2, dtype=jnp.float32) / head_dim))
    freqs = position_ids.astype(jnp.float32)[..., None] * inv_freq[None, None, :]
    emb = jnp.concatenate([freqs, freqs], axis=-1)  # [B, T, hd]
    return jnp.cos(emb), jnp.sin(emb)


def _rotate_half(x):
    h = x.shape[-1] // 2
    return jnp.concatenate([-x[..., h:], x[..., :h]], axis=-1)


def apply_rope_bthd(x, cos, sin):
    """x: [B, T, n, hd]; cos/sin: [B, T, hd] (head-last layout -> no transposes needed)."""
    cos = cos[:, :, None, :]
    sin = sin[:, :, None, :]
    return x * cos + _rotate_half(x) * sin


# ----------------------------- GemmaAttention module -----------------------------

class GemmaAttentionPallas:
    def __init__(self, hidden_size, num_heads, num_kv_heads, head_dim, rope_theta, key):
        self.hidden_size = hidden_size
        self.num_heads = num_heads
        self.num_kv_heads = num_kv_heads
        self.head_dim = head_dim
        self.rope_theta = rope_theta
        k1, k2, k3, k4 = jax.random.split(key, 4)
        s = 0.02
        # Stored as [in, out] so forward is x @ W (PyTorch Linear stores [out, in]).
        self.Wq = s * jax.random.normal(k1, (hidden_size, num_heads * head_dim), jnp.float32)
        self.Wk = s * jax.random.normal(k2, (hidden_size, num_kv_heads * head_dim), jnp.float32)
        self.Wv = s * jax.random.normal(k3, (hidden_size, num_kv_heads * head_dim), jnp.float32)
        self.Wo = s * jax.random.normal(k4, (num_heads * head_dim, hidden_size), jnp.float32)
        # Fused, bf16 weights for the Pallas path (QKV read the activation once).
        # 1/sqrt(hd) is folded into Wq (RoPE is linear, so scaling commutes with it).
        scale = 1.0 / math.sqrt(head_dim)
        self.Wqkv_bf16 = jnp.concatenate(
            [self.Wq * scale, self.Wk, self.Wv], axis=1).astype(jnp.bfloat16)
        self.Wo_bf16 = self.Wo.astype(jnp.bfloat16)

    def __call__(self, hidden_states, attention_mask, position_ids):
        B, T, H = hidden_states.shape
        nH, nKV, hd = self.num_heads, self.num_kv_heads, self.head_dim

        x2d = hidden_states.reshape(B * T, H).astype(jnp.bfloat16)
        qkv = pallas_matmul(x2d, self.Wqkv_bf16, out_dtype=jnp.bfloat16)  # [B*T, (nH+2nKV)*hd]
        qkv = qkv.reshape(B, T, -1)

        q_sz, kv_sz = nH * hd, nKV * hd
        q = qkv[..., :q_sz]
        k = qkv[..., q_sz:q_sz + kv_sz]
        v = qkv[..., q_sz + kv_sz:]

        cos, sin = rope_cos_sin(position_ids, hd, self.rope_theta)
        # RoPE on head-last views (free reshapes; no [B,nH,T,hd] transposes).
        q = apply_rope_bthd(q.reshape(B, T, nH, hd), cos, sin)
        k = apply_rope_bthd(k.reshape(B, T, nKV, hd), cos, sin)
        q = q.reshape(B, T, q_sz).astype(jnp.bfloat16)
        k = k.reshape(B, T, kv_sz).astype(jnp.bfloat16)

        # TODO(synk): attention_mask is assumed to be the standard causal mask and is
        # regenerated in-kernel (broadcasted_iota) instead of being DMA'd.
        attn = pallas_attention(q, k, v, num_heads=nH, num_kv_heads=nKV,
                                head_dim=hd, causal=True)      # bf16 [B, T, nH*hd]

        out = pallas_matmul(attn.reshape(B * T, q_sz), self.Wo_bf16,
                            out_dtype=jnp.float32).reshape(B, T, H)
        return out


# ----------------------------- Reference (plain JAX, f32) -----------------------------

def reference_forward(mod, hidden_states, attention_mask, position_ids):
    B, T, H = hidden_states.shape
    nH, nKV, hd = mod.num_heads, mod.num_kv_heads, mod.head_dim
    q = (hidden_states @ mod.Wq).reshape(B, T, nH, hd).transpose(0, 2, 1, 3)
    k = (hidden_states @ mod.Wk).reshape(B, T, nKV, hd).transpose(0, 2, 1, 3)
    v = (hidden_states @ mod.Wv).reshape(B, T, nKV, hd).transpose(0, 2, 1, 3)
    cos, sin = rope_cos_sin(position_ids, hd, mod.rope_theta)
    cos_h = cos[:, None, :, :]
    sin_h = sin[:, None, :, :]
    q = q * cos_h + _rotate_half(q) * sin_h
    k = k * cos_h + _rotate_half(k) * sin_h
    groups = nH // nKV
    k = jnp.repeat(k, groups, axis=1)
    v = jnp.repeat(v, groups, axis=1)
    scores = jnp.einsum("bhqd,bhkd->bhqk", q, k) / math.sqrt(hd) + attention_mask
    p = jax.nn.softmax(scores, axis=-1)
    attn = jnp.einsum("bhqk,bhkd->bhqd", p, v)
    attn = attn.transpose(0, 2, 1, 3).reshape(B, T, nH * hd)
    return attn @ mod.Wo


# ----------------------------- main -----------------------------

if __name__ == "__main__":
    B, T, H = 2, 8, 32
    num_heads, num_kv_heads, head_dim = 4, 2, 16
    rope_theta = 10000.0

    key = jax.random.PRNGKey(0)
    k_w, k_x = jax.random.split(key)

    mod = GemmaAttentionPallas(H, num_heads, num_kv_heads, head_dim, rope_theta, k_w)

    hidden_states = jax.random.normal(k_x, (B, T, H), jnp.float32)
    position_ids = jnp.broadcast_to(jnp.arange(T, dtype=jnp.int32)[None, :], (B, T))
    # Additive causal mask (used by the f32 reference; the kernel generates it in-register).
    causal = jnp.tril(jnp.ones((T, T), jnp.bool_))
    attention_mask = jnp.where(causal, 0.0, -1e9).astype(jnp.float32)[None, None, :, :]
    attention_mask = jnp.broadcast_to(attention_mask, (B, 1, T, T))

    out = mod(hidden_states, attention_mask, position_ids)
    out = jax.block_until_ready(out)

    ref = reference_forward(mod, hidden_states, attention_mask, position_ids)
    ref = jax.block_until_ready(ref)

    max_err = float(jnp.max(jnp.abs(out - ref)))
    denom = float(jnp.max(jnp.abs(ref))) + 1e-8
    rel_err = max_err / denom
    # Tolerance relaxed for bf16 MXU compute (f32 accumulation).
    if not (out.shape == (B, T, H) and rel_err < 5e-2):
        raise AssertionError(
            f"mismatch vs reference: shape={out.shape}, max_err={max_err}, rel_err={rel_err}")

    print("KERNEL_OK")
</pallas_src>

<mosaic_0001>
module attributes {stable_mosaic.version = 11 : i64} {
  func.func @_matmul_kernel(%arg0: i32, %arg1: i32, %arg2: i32, %arg3: memref<16x32xbf16, #tpu.memory_space<vmem>>, %arg4: memref<32x128xbf16, #tpu.memory_space<vmem>>, %arg5: memref<16x128xbf16, #tpu.memory_space<vmem>>, %arg6: memref<16x128xf32, #tpu.memory_space<vmem>>) attributes {dimension_semantics = [#tpu.dimension_semantics<parallel>, #tpu.dimension_semantics<parallel>, #tpu.dimension_semantics<arbitrary>], iteration_bounds = array<i64: 1, 1, 1>, scalar_prefetch = 0 : i64, scratch_operands = 1 : i64, tpu.core_type = #tpu.core_type<tc>, window_params = [{transform_indices = @transform_0, window_bounds = array<i64: 16, 32>}, {transform_indices = @transform_1, window_bounds = array<i64: 32, 128>}, {transform_indices = @transform_2, window_bounds = array<i64: 16, 128>}]} {
    %c0_i32 = arith.constant 0 : i32
    %0 = arith.cmpi eq, %arg2, %c0_i32 : i32
    %1 = arith.extui %0 : i1 to i32
    %c0_i32_0 = arith.constant 0 : i32
    %2 = arith.cmpi ne, %1, %c0_i32_0 : i32
    scf.if %2 {
      %cst_10 = arith.constant 0.000000e+00 : f32
      %12 = vector.broadcast %cst_10 : f32 to vector<16x128xf32>
      %c0_11 = arith.constant 0 : index
      %c0_12 = arith.constant 0 : index
      %13 = vector.load %arg6[%c0_11, %c0_12] : memref<16x128xf32, #tpu.memory_space<vmem>>, vector<16x128xf32>
      tpu.vector_store %arg6[%c0_11, %c0_12], %12 {strides = array<i32>} : memref<16x128xf32, #tpu.memory_space<vmem>>, vector<16x128xf32>,
    } else {
    }
    %c0 = arith.constant 0 : index
    %c0_1 = arith.constant 0 : index
    %3 = vector.load %arg6[%c0, %c0_1] : memref<16x128xf32, #tpu.memory_space<vmem>>, vector<16x128xf32>
    %c0_2 = arith.constant 0 : index
    %c0_3 = arith.constant 0 : index
    %4 = vector.load %arg3[%c0_2, %c0_3] : memref<16x32xbf16, #tpu.memory_space<vmem>>, vector<16x32xbf16>
    %c0_4 = arith.constant 0 : index
    %c0_5 = arith.constant 0 : index
    %5 = vector.load %arg4[%c0_4, %c0_5] : memref<32x128xbf16, #tpu.memory_space<vmem>>, vector<32x128xbf16>
    %cst = arith.constant dense<0.000000e+00> : vector<16x128xf32>
    %6 = tpu.matmul %4, %5, %cst {dimension_numbers = #tpu.dot_dimension_numbers<[1], [0], [0], [1], [0, 0, 1, 1], [], []>} : vector<16x32xbf16>, vector<32x128xbf16>, vector<16x128xf32> -> vector<16x128xf32>
    %7 = arith.addf %3, %6 : vector<16x128xf32>
    %c0_6 = arith.constant 0 : index
    %c0_7 = arith.constant 0 : index
    %8 = vector.load %arg6[%c0_6, %c0_7] : memref<16x128xf32, #tpu.memory_space<vmem>>, vector<16x128xf32>
    tpu.vector_store %arg6[%c0_6, %c0_7], %7 {strides = array<i32>} : memref<16x128xf32, #tpu.memory_space<vmem>>, vector<16x128xf32>,
    %c0_i32_8 = arith.constant 0 : i32
    %9 = arith.cmpi eq, %arg2, %c0_i32_8 : i32
    %10 = arith.extui %9 : i1 to i32
    %c0_i32_9 = arith.constant 0 : i32
    %11 = arith.cmpi ne, %10, %c0_i32_9 : i32
    scf.if %11 {
      %c0_10 = arith.constant 0 : index
      %c0_11 = arith.constant 0 : index
      %12 = vector.load %arg6[%c0_10, %c0_11] : memref<16x128xf32, #tpu.memory_space<vmem>>, vector<16x128xf32>
      %13 = arith.truncf %12 : vector<16x128xf32> to vector<16x128xbf16>
      %c0_12 = arith.constant 0 : index
      %c0_13 = arith.constant 0 : index
      %14 = vector.load %arg5[%c0_12, %c0_13] : memref<16x128xbf16, #tpu.memory_space<vmem>>, vector<16x128xbf16>
      tpu.vector_store %arg5[%c0_12, %c0_13], %13 {strides = array<i32>} : memref<16x128xbf16, #tpu.memory_space<vmem>>, vector<16x128xbf16>,
    } else {
    }
    return
  }
  func.func @transform_0(%arg0: i32, %arg1: i32, %arg2: i32) -> (i32, i32) {
    %c0_i32 = arith.constant 0 : i32
    return %arg0, %arg2 : i32, i32
  }
  func.func @transform_1(%arg0: i32, %arg1: i32, %arg2: i32) -> (i32, i32) {
    %c0_i32 = arith.constant 0 : i32
    return %arg2, %arg1 : i32, i32
  }
  func.func @transform_2(%arg0: i32, %arg1: i32, %arg2: i32) -> (i32, i32) {
    %c0_i32 = arith.constant 0 : i32
    return %arg0, %arg1 : i32, i32
  }
}

</mosaic_0001>

<bundles_post_ra>
// kernel: tpu_custom_call.1
= control target key start
LH: loop header
LB: loop body
LE: loop exit
PB: predicated region body
PF: predicated region fallthrough
CT: control target
= control target key end

     0   :  { %7 = vsyncpa [#allocation4], 0  ;;  %s294_s0 = inlined_call_operand.hbm [shape: bf16[16,32], index: 0, kind: input, shape index: {}]   ;;  %s295_s1 = inlined_call_operand.hbm [shape: bf16[32,128], index: 1, kind: input, shape index: {}]   ;;  %s296_s2 = inlined_call_operand.hbm [shape: bf16[16,128], index: 2, kind: output, shape index: {}]  }
   0x1   :  { %8 = vsyncpa [#allocation7], 0 }
   0x2   :  { %9 = vsyncpa [#allocation5], 0  ;;  %s254_s9 = smov [#allocation3]  }
   0x3   :  { %s15_s10 = sshll.u32 %s254_s9, 4  ;;  %s16_s10 = int_to_ptr.vmem [resolvable:$true] %s15_s10 }
   0x4   :  { %s196_s11 = scalar_lea.vmem %s16_s10, 128  ;;  %p201_p1 = scmp.lt.s32.totalorder %s16_s10, %s16_s10 }
   0x5   :  { %p197_p0 = scmp.ne.s32.totalorder %s16_s10, %s196_s11  ;;  %p202_p2 = scmp.lt.s32.totalorder %s196_s11, %s196_s11 }
   0x7   :  { %p203_p3 = por %p202_p2, %p201_p1 }
   0x9   :  { %p204_p4 = pnand %p203_p3, %p197_p0 }
   0xb   :  { %207 = shalt.err (!%p204_p4)
}
   0xc   :  { %s255_s12 = smov 64   ;;  %s256_s13 = smov 4  }
   0xd   :  { %21 = dma.hbm_to_vmem [thread:$0]  %s294_s0, 128, %s16_s10, [#allocation4], %s255_s12, %s255_s12, %s256_s13  }
   0xe   :  { %s257_s16 = smov [#allocation6]  }
   0xf   :  { %s27_s17 = sshll.u32 %s257_s16, 4  ;;  %s28_s17 = int_to_ptr.vmem [resolvable:$true] %s27_s17 }
  0x10   :  { %s216_s18 = scalar_lea.vmem %s28_s17, 256  ;;  %p221_p6 = scmp.lt.s32.totalorder %s28_s17, %s28_s17 }
  0x11   :  { %p217_p5 = scmp.ne.s32.totalorder %s28_s17, %s216_s18  ;;  %p222_p7 = scmp.lt.s32.totalorder %s216_s18, %s216_s18 }
  0x13   :  { %p223_p8 = por %p222_p7, %p221_p6 }
  0x15   :  { %p224_p9 = pnand %p223_p8, %p217_p5 }
  0x17   :  { %227 = shalt.err (!%p224_p9)
}
  0x18   :  { %33 = dma.hbm_to_vmem [thread:$0]  %s295_s1, 256, %s28_s17, [#allocation7], %s255_s12, %s255_s12, %s256_s13  }
  0x19   :  { %248 = dma.done.wait [#allocation4], 128  }
  0x1a   :  { %249 = vsyncadd [#allocation4], 4294967168 }
  0x1b   :  { %250 = dma.done.wait [#allocation7], 256  }
  0x1c   :  { %251 = vsyncadd [#allocation7], 4294967040  ;;  %v258_v0 = vmov 0.0   ;;  %vm259_vm0 = vmmov 0   ;;  %v185_v1 = vld [vmem:[#allocation6 + $0x8] sm:$0xff]   ;;  %v186_v2 = vld [vmem:[#allocation6] sm:$0xff]  }
  0x1d   :  { %170 = vmatprep.subr.bf16.mxu0 %v258_v0  ;;  %174 = vmatprep.mubr.msk.bf16.mxu0 %vm259_vm0, %v258_v0  ;;  %v187_v3 = vld [vmem:[#allocation3] sm:$0xff]   ;;  %vm72_vm1 = vcmask 261120   ;;  %s260_s0 = smov [#allocation8]  }
  0x1e   :  { %171 = vmatpush3.bf16.msra.mxu0 %v185_v1  ;;  %s141_s1 = sshll.u32 %s260_s0, 4  ;;  %s142_s1 = int_to_ptr.vmem [resolvable:$true] %s141_s1 }
  0x1f   :  { %172 = vmatprep.subr.bf16.mxu0 %v258_v0  ;;  %s228_s21 = scalar_lea.vmem %s142_s1, 128  ;;  %p233_p11 = scmp.lt.s32.totalorder %s142_s1, %s142_s1 }
  0x20   :  { %p229_p10 = scmp.ne.s32.totalorder %s142_s1, %s228_s21  ;;  %p234_p12 = scmp.lt.s32.totalorder %s228_s21, %s228_s21 }
  0x22   :  { %173 = vmatpush3.bf16.msra.mxu0 %v186_v2  ;;  %p235_p13 = por %p234_p12, %p233_p11 }
  0x24   :  { %p236_p0 = pnand %p235_p13, %p229_p10 }
  0x25   :  { %175 = vmatmul.mubr.msk.bf16.vlgmr.msra.gmra.mxu0 %vm72_vm1, %v187_v3 }
  0xe5   :  { %v110_v4 = vpop.f32.mrf.mxu0 }
  0xe7   :  { %v176_v5 = vpop.f32.mrf.mxu0 }
  0xe9   :  { %v113_v6 = vpop.f32.mrf.mxu0 }
  0xea   :  { %v165_v7 = vpack.c.bf16 %v113_v6, %v110_v4 }
  0xeb   :  { %v177_v8 = vpop.f32.mrf.mxu0 }
  0xec   :  { %166 = vst [vmem:[#allocation8] sm:$0xff] %v165_v7  }
  0xed   :  { %239 = shalt.err (!%p236_p0)
}
  0xee   :  { %147 = dma.vmem_to_hbm [thread:$0]  %s142_s1, 128, %s296_s2, [#allocation5], %s255_s12, %s255_s12, %s256_s13  }
  0xef   :  { %252 = dma.done.wait [#allocation5], 128  }
  0xf0   :  { %253 = vsyncadd [#allocation5], 4294967168 }
  0xf1   :  { %151 = vsyncpa [#allocation4], 1 }
  0xf2   :  { %152 = vsyncpa [#allocation7], 1 }
  0xf3   :  { %153 = vsyncpa [#allocation5], 1 }

</bundles_post_ra>
